<compile_context>
chip_gen: v7x
topology: tpu7x:2x2x1
jax: 0.10.0
libtpu: 0.0.40
codegen_flags: <defaults>
</compile_context>

<pallas_src>
import jax
import jax.numpy as jnp
from jax.experimental import pallas as pl
from jax.experimental.pallas import tpu as pltpu


def _sum_of_weights_loss_kernel(k_ref, o_ref):
    # Full-array reduction (accumulate in f32) + |1 - s|, scalar store to SMEM.
    s = jnp.sum(k_ref[...], dtype=jnp.float32)
    o_ref[0, 0] = jnp.abs(jnp.float32(1.0) - s)


def sum_of_weights_loss(kernel: jax.Array) -> jax.Array:
    """|1 - sum(kernel)| computed in a Pallas TPU kernel. Returns a 0-d f32 scalar."""
    assert kernel.ndim == 2, "expected a 2-D blur kernel (KH, KW)"
    kh, kw = kernel.shape
    out = pl.pallas_call(
        _sum_of_weights_loss_kernel,
        out_shape=jax.ShapeDtypeStruct((1, 1), jnp.float32),
        # No grid: single invocation, whole array as one VMEM operand.
        in_specs=[pl.BlockSpec(memory_space=pltpu.MemorySpace.VMEM)],
        # Scalar result lives in SMEM (avoids a padded (8,128) VMEM output tile).
        out_specs=pl.BlockSpec(memory_space=pltpu.MemorySpace.SMEM),
        cost_estimate=pl.CostEstimate(
            flops=kh * kw,
            transcendentals=0,
            bytes_accessed=kh * kw * kernel.dtype.itemsize + 4,
        ),
    )(kernel)
    return out.reshape(())


if __name__ == "__main__":
    # Deterministic synthetic "kernel" the generator would be imitating.
    # KernelGAN uses a 13x13 kernel; use that small shape here.
    key = jax.random.PRNGKey(0)
    k = jax.random.uniform(key, (13, 13), dtype=jnp.float32)
    # Normalize-ish but not exactly to 1, so the loss is nontrivial.
    k = k / (jnp.sum(k) * 1.25)

    loss = jax.block_until_ready(sum_of_weights_loss(k))

    # Reference check in plain JAX (same math as the PyTorch module).
    ref = jnp.abs(1.0 - jnp.sum(k))
    assert jnp.allclose(loss, ref, atol=1e-6), (loss, ref)

    print("KERNEL_OK")
</pallas_src>

<mosaic_0001>
module attributes {stable_mosaic.version = 11 : i64} {
  func.func @_sum_of_weights_loss_kernel(%arg0: memref<13x13xf32, #tpu.memory_space<vmem>>, %arg1: memref<1x1xf32, #tpu.memory_space<smem>>) attributes {dimension_semantics = [], scalar_prefetch = 0 : i64, scratch_operands = 0 : i64, tpu.core_type = #tpu.core_type<tc>} {
    %c0 = arith.constant 0 : index
    %c0_0 = arith.constant 0 : index
    %0 = vector.load %arg0[%c0, %c0_0] : memref<13x13xf32, #tpu.memory_space<vmem>>, vector<13x13xf32>
    %1 = vector.shape_cast %0 : vector<13x13xf32> to vector<1x13x13xf32>
    %cst = arith.constant dense<0.000000e+00> : vector<1xf32>
    %2 = vector.multi_reduction <add>, %1, %cst [1, 2] : vector<1x13x13xf32> to vector<1xf32>
    %3 = vector.shape_cast %2 : vector<1xf32> to vector<1x1x1xf32>
    %4 = vector.extract %3[0, 0, 0] : f32 from vector<1x1x1xf32>
    %cst_1 = arith.constant 1.000000e+00 : f32
    %5 = arith.subf %cst_1, %4 : f32
    %6 = math.absf %5 : f32
    %c0_2 = arith.constant 0 : index
    %c0_3 = arith.constant 0 : index
    %7 = memref.load %arg1[%c0_2, %c0_3] : memref<1x1xf32, #tpu.memory_space<smem>>
    memref.store %6, %arg1[%c0_2, %c0_3] : memref<1x1xf32, #tpu.memory_space<smem>>
    return
  }
}

</mosaic_0001>

<bundles_post_ra>
// kernel: tpu_custom_call.1
= control target key start
LH: loop header
LB: loop body
LE: loop exit
PB: predicated region body
PF: predicated region fallthrough
CT: control target
= control target key end

     0   :  { %6 = vsyncpa [#allocation3], 0  ;;  %s137_s0 = inlined_call_operand.hbm [shape: f32[13,13], index: 0, kind: input, shape index: {}]   ;;  %s138_s1 = inlined_call_operand.hbm [shape: f32[1,1], index: 1, kind: output, shape index: {}]  }
   0x1   :  { %7 = vsyncpa [#allocation4], 0  ;;  %s99_s6 = smov [#allocation2]   ;;  %s63_s10 = scalar_lea.hbm %s137_s0, 256 }
   0x2   :  { %s13_s7 = sshll.u32 %s99_s6, 4  ;;  %p64_p0 = scmp.ne.s32.totalorder %s137_s0, %s63_s10  ;;  %s14_s7 = int_to_ptr.vmem [resolvable:$true] %s13_s7 }
   0x3   :  { %p67_p1 = scmp.lt.u32.totalorder %s63_s10, %s137_s0 }
   0x5   :  { %p69_p2 = pnand %p67_p1, %p64_p0 }
   0x7   :  { %72 = shalt.err (!%p69_p2)
}
   0x8   :  { %s73_s15 = scalar_lea.vmem %s14_s7, 256  ;;  %p78_p4 = scmp.lt.s32.totalorder %s14_s7, %s14_s7 }
   0x9   :  { %p74_p3 = scmp.ne.s32.totalorder %s14_s7, %s73_s15  ;;  %p79_p5 = scmp.lt.s32.totalorder %s73_s15, %s73_s15 }
   0xb   :  { %p80_p6 = por %p79_p5, %p78_p4 }
   0xd   :  { %p81_p7 = pnand %p80_p6, %p74_p3 }
   0xf   :  { %84 = shalt.err (!%p81_p7)
}
  0x10   :  { %s100_s16 = smov 128   ;;  %s101_s17 = smov 8  }
  0x11   :  { %19 = dma.hbm_to_vmem [thread:$0]  %s137_s0, 256, %s14_s7, [#allocation3], %s100_s16, %s100_s16, %s101_s17  }
  0x12   :  { %95 = dma.done.wait [#allocation3], 256  }
  0x13   :  { %96 = vsyncadd [#allocation3], 4294967040  ;;  %vm25_vm0 = vcmask 105472   ;;  %vm27_vm1 = vcmask 102400   ;;  %v23_v0 = vld [vmem:[#allocation2] sm:$0xff]  ;;  %s85_s24 = scalar_lea.hbm %s138_s1, 16 }
  0x14   :  { %v24_v1 = vld [vmem:[#allocation2 + $0x8] sm:$0x1f]  ;;  %v26_v2 = vsel %vm25_vm0, %v23_v0, 0.0  ;;  %p86_p8 = scmp.ne.s32.totalorder %s138_s1, %s85_s24  ;;  %p89_p9 = scmp.lt.u32.totalorder %s85_s24, %s138_s1 }
  0x15   :  { %v28_v3 = vsel %vm27_vm1, %v24_v1, 0.0 }
  0x16   :  { %v29_v4 = vadd.f32 %v28_v3, %v26_v2  ;;  %p91_p10 = pnand %p89_p9, %p86_p8 }
  0x18   :  { %30 = vadd.xlane.f32.xlu0 %v29_v4 }
  0xa5   :  { %v31_v5 = vpop.xlane.xlu0 %30 }
  0xa6   :  { %v32_v6 = vrot.slane %v31_v5, 4 }
  0xa8   :  { %v33_v7 = vadd.f32 %v32_v6, %v31_v5 }
  0xaa   :  { %v34_v8 = vrot.slane %v33_v7, 2 }
  0xac   :  { %v35_v9 = vadd.f32 %v34_v8, %v33_v7 }
  0xae   :  { %v36_v10 = vrot.slane %v35_v9, 1 }
  0xb0   :  { %v37_v11 = vadd.f32 %v36_v10, %v35_v9 }
  0xb2   :  { %57 = vpush %v37_v11 }
  0xe3   :  { %s58_s20 = spop %57 }
  0xe4   :  { %s39_s0 = ssub.f32 1.0, %s58_s20 }
  0xe6   :  { %s40_s21 = sand.u32 2147483647, %s39_s0 }
  0xe7   :  { %42 = sst [smem:[#allocation5]] %s40_s21 }
  0xe8   :  { %94 = shalt.err (!%p91_p10)
}
  0xe9   :  { %s102_s29 = smov [#allocation5]  }
  0xea   :  { %50 = dma.smem_to_hbm %s102_s29, 16, %s138_s1, [#allocation4]  }
  0xeb   :  { %97 = dma.done.wait [#allocation4], 16  }
  0xec   :  { %98 = vsyncadd [#allocation4], 4294967280 }
  0xed   :  { %54 = sfence }
  0xee   :  { %55 = vsyncpa [#allocation3], 1 }
  0xef   :  { %56 = vsyncpa [#allocation4], 1 }

</bundles_post_ra>
